<compile_context>
chip_gen: v6e
topology: v6e:2x2x1
jax: 0.10.0
libtpu: 0.0.40
codegen_flags: <defaults>
</compile_context>

<pallas_src>
import functools

import jax
import jax.numpy as jnp
from jax.experimental import pallas as pl
from jax.experimental.pallas import tpu as pltpu


def _round_up(x: int, m: int) -> int:
    return ((x + m - 1) // m) * m


def qnetwork_kernel(x_ref, w1_ref, b1_ref, w2_ref, b2_ref, w3_ref, b3_ref, o_ref):
    # fc1 + ReLU: bf16 MXU operands, f32 accumulation, f32 elementwise.
    h1 = jnp.dot(x_ref[...], w1_ref[...], preferred_element_type=jnp.float32)
    h1 = jnp.maximum(h1 + b1_ref[...], 0.0)
    # fc2 + ReLU
    h2 = jnp.dot(h1.astype(jnp.bfloat16), w2_ref[...], preferred_element_type=jnp.float32)
    h2 = jnp.maximum(h2 + b2_ref[...], 0.0)
    # output layer (no activation); zero-padded action columns stay exactly zero.
    out = jnp.dot(h2.astype(jnp.bfloat16), w3_ref[...], preferred_element_type=jnp.float32)
    o_ref[...] = (out + b3_ref[...]).astype(o_ref.dtype)


def prepare_params(params, *, lane_pad_out: bool = True, pad_hidden: bool = True):
    """One-time param prep (do NOT call per forward): bf16 weights, zero-padded layouts.

    Hidden-dim zero padding to 128 lanes is exact under ReLU; action-dim zero padding only adds
    zero output columns that are sliced off after the kernel.
    """
    w1, b1 = params["w1"], params["b1"]
    w2, b2 = params["w2"], params["b2"]
    w3, b3 = params["w3"], params["b3"]
    hidden = w1.shape[1]
    action = w3.shape[1]
    h_pad = _round_up(hidden, 128) if pad_hidden else hidden
    a_pad = _round_up(action, 128) if lane_pad_out else action

    w1p = jnp.pad(w1, ((0, 0), (0, h_pad - hidden)))
    b1p = jnp.pad(b1, ((0, 0), (0, h_pad - hidden)))
    w2p = jnp.pad(w2, ((0, h_pad - hidden), (0, h_pad - hidden)))
    b2p = jnp.pad(b2, ((0, 0), (0, h_pad - hidden)))
    w3p = jnp.pad(w3, ((0, h_pad - hidden), (0, a_pad - action)))
    b3p = jnp.pad(b3, ((0, 0), (0, a_pad - action)))

    return {
        "w1": w1p.astype(jnp.bfloat16), "b1": b1p.astype(jnp.float32),
        "w2": w2p.astype(jnp.bfloat16), "b2": b2p.astype(jnp.float32),
        "w3": w3p.astype(jnp.bfloat16), "b3": b3p.astype(jnp.float32),
    }


@functools.partial(jax.jit, static_argnames=("action_size", "tile_b", "out_dtype"))
def qnetwork_forward(x, prepared, action_size: int, *, tile_b: int = 1024,
                     out_dtype=jnp.bfloat16):
    """x: [B, state_size] float32. prepared: output of prepare_params()."""
    B, state_size = x.shape
    a_out = prepared["w3"].shape[1]

    # Batch tiling: bf16 x tiles need sublane multiples of 16; aim for >=2 grid steps when the
    # batch is large enough so both v7x TensorCores get work under ("parallel",) semantics.
    tb_req = max(16, _round_up(int(tile_b), 16))
    b_min = _round_up(B, 16)
    half = _round_up(b_min // 2, 16) if b_min > 16 else 16
    tb = min(tb_req, half)
    b_pad = _round_up(b_min, tb)

    x_p = x.astype(jnp.bfloat16)
    if b_pad != B:
        x_p = jnp.pad(x_p, ((0, b_pad - B), (0, 0)))

    # Weights/biases stay VMEM-resident across all batch tiles (constant index_map).
    const = lambda a: pl.BlockSpec(a.shape, lambda i: (0,) * a.ndim)

    out_padded = pl.pallas_call(
        qnetwork_kernel,
        out_shape=jax.ShapeDtypeStruct((b_pad, a_out), out_dtype),
        grid=(b_pad // tb,),
        in_specs=[
            pl.BlockSpec((tb, state_size), lambda i: (i, 0)),  # x: streamed over batch
            const(prepared["w1"]), const(prepared["b1"]),
            const(prepared["w2"]), const(prepared["b2"]),
            const(prepared["w3"]), const(prepared["b3"]),
        ],
        out_specs=pl.BlockSpec((tb, a_out), lambda i: (i, 0)),
        compiler_params=pltpu.CompilerParams(
            dimension_semantics=("parallel",),  # batch tiles shard across TCs (v7x megacore)
        ),
    )(x_p, prepared["w1"], prepared["b1"], prepared["w2"], prepared["b2"],
      prepared["w3"], prepared["b3"])

    # Skip the extra slice op entirely when nothing was padded; padded batch rows are NOT zero
    # (biases propagate through ReLU) so the [:B] trim must stay whenever b_pad != B.
    if b_pad == B and a_out == action_size:
        return out_padded
    return out_padded[:B, :action_size]


def init_params(key, state_size, action_size, layer_size):
    """Deterministic init mimicking nn.Linear default (U[-1/sqrt(fan_in), 1/sqrt(fan_in)]).

    Weights stored as [in_features, out_features] (transpose of PyTorch's [out, in])."""
    ks = jax.random.split(key, 6)

    def linear(kw, kb, fan_in, fan_out):
        bound = 1.0 / jnp.sqrt(fan_in)
        w = jax.random.uniform(kw, (fan_in, fan_out), jnp.float32, -bound, bound)
        b = jax.random.uniform(kb, (1, fan_out), jnp.float32, -bound, bound)
        return w, b

    w1, b1 = linear(ks[0], ks[1], state_size, layer_size)
    w2, b2 = linear(ks[2], ks[3], layer_size, layer_size)
    w3, b3 = linear(ks[4], ks[5], layer_size, action_size)
    return {"w1": w1, "b1": b1, "w2": w2, "b2": b2, "w3": w3, "b3": b3}


def reference_forward(x, params, out_dtype=jnp.bfloat16):
    """Plain-JAX reference with the same bf16-operand / f32-accumulate numerics as the kernel."""
    bf = jnp.bfloat16
    h1 = jnp.maximum(
        jnp.dot(x.astype(bf), params["w1"].astype(bf),
                preferred_element_type=jnp.float32) + params["b1"], 0.0)
    h2 = jnp.maximum(
        jnp.dot(h1.astype(bf), params["w2"].astype(bf),
                preferred_element_type=jnp.float32) + params["b2"], 0.0)
    out = jnp.dot(h2.astype(bf), params["w3"].astype(bf),
                  preferred_element_type=jnp.float32) + params["b3"]
    return out.astype(out_dtype)


if __name__ == "__main__":
    key = jax.random.PRNGKey(0)
    k_x, k_p = jax.random.split(key)

    batch = 8
    state_size = 8
    action_size = 4
    layer_size = 64  # matches QNetwork default

    x = jax.random.normal(k_x, (batch, state_size), jnp.float32)
    raw_params = init_params(k_p, state_size, action_size, layer_size)
    prepared = prepare_params(raw_params)  # one-time: bf16 cast + lane/hidden padding

    out = qnetwork_forward(x, prepared, action_size)
    jax.block_until_ready(out)

    ref = reference_forward(x, raw_params)
    assert out.shape == (batch, action_size), out.shape
    err = float(jnp.max(jnp.abs(out.astype(jnp.float32) - ref.astype(jnp.float32))))
    assert err < 3e-2, err

    print("KERNEL_OK")
</pallas_src>

<mosaic_0001>
module attributes {stable_mosaic.version = 11 : i64} {
  func.func @qnetwork_kernel(%arg0: i32, %arg1: memref<16x8xbf16, #tpu.memory_space<vmem>>, %arg2: memref<8x128xbf16, #tpu.memory_space<vmem>>, %arg3: memref<1x128xf32, #tpu.memory_space<vmem>>, %arg4: memref<128x128xbf16, #tpu.memory_space<vmem>>, %arg5: memref<1x128xf32, #tpu.memory_space<vmem>>, %arg6: memref<128x128xbf16, #tpu.memory_space<vmem>>, %arg7: memref<1x128xf32, #tpu.memory_space<vmem>>, %arg8: memref<16x128xbf16, #tpu.memory_space<vmem>>) attributes {dimension_semantics = [#tpu.dimension_semantics<parallel>], iteration_bounds = array<i64: 1>, scalar_prefetch = 0 : i64, scratch_operands = 0 : i64, tpu.core_type = #tpu.core_type<tc>, window_params = [{transform_indices = @transform_0, window_bounds = array<i64: 16, 8>}, {pipeline_mode = #tpu.pipeline_mode<synchronous>, transform_indices = @transform_1, window_bounds = array<i64: 8, 128>}, {pipeline_mode = #tpu.pipeline_mode<synchronous>, transform_indices = @transform_2, window_bounds = array<i64: 1, 128>}, {pipeline_mode = #tpu.pipeline_mode<synchronous>, transform_indices = @transform_3, window_bounds = array<i64: 128, 128>}, {pipeline_mode = #tpu.pipeline_mode<synchronous>, transform_indices = @transform_4, window_bounds = array<i64: 1, 128>}, {pipeline_mode = #tpu.pipeline_mode<synchronous>, transform_indices = @transform_5, window_bounds = array<i64: 128, 128>}, {pipeline_mode = #tpu.pipeline_mode<synchronous>, transform_indices = @transform_6, window_bounds = array<i64: 1, 128>}, {transform_indices = @transform_7, window_bounds = array<i64: 16, 128>}]} {
    %c0 = arith.constant 0 : index
    %c0_0 = arith.constant 0 : index
    %0 = vector.load %arg1[%c0, %c0_0] : memref<16x8xbf16, #tpu.memory_space<vmem>>, vector<16x8xbf16>
    %c0_1 = arith.constant 0 : index
    %c0_2 = arith.constant 0 : index
    %1 = vector.load %arg2[%c0_1, %c0_2] : memref<8x128xbf16, #tpu.memory_space<vmem>>, vector<8x128xbf16>
    %cst = arith.constant dense<0.000000e+00> : vector<16x128xf32>
    %2 = tpu.matmul %0, %1, %cst {dimension_numbers = #tpu.dot_dimension_numbers<[1], [0], [0], [1], [0, 0, 1, 1], [], []>} : vector<16x8xbf16>, vector<8x128xbf16>, vector<16x128xf32> -> vector<16x128xf32>
    %c0_3 = arith.constant 0 : index
    %c0_4 = arith.constant 0 : index
    %3 = vector.load %arg3[%c0_3, %c0_4] : memref<1x128xf32, #tpu.memory_space<vmem>>, vector<1x128xf32>
    %4 = vector.broadcast %3 : vector<1x128xf32> to vector<16x128xf32>
    %5 = arith.addf %2, %4 : vector<16x128xf32>
    %cst_5 = arith.constant 0.000000e+00 : f32
    %6 = vector.broadcast %cst_5 : f32 to vector<16x128xf32>
    %7 = arith.maximumf %5, %6 : vector<16x128xf32>
    %8 = arith.truncf %7 : vector<16x128xf32> to vector<16x128xbf16>
    %c0_6 = arith.constant 0 : index
    %c0_7 = arith.constant 0 : index
    %9 = vector.load %arg4[%c0_6, %c0_7] : memref<128x128xbf16, #tpu.memory_space<vmem>>, vector<128x128xbf16>
    %cst_8 = arith.constant dense<0.000000e+00> : vector<16x128xf32>
    %10 = tpu.matmul %8, %9, %cst_8 {dimension_numbers = #tpu.dot_dimension_numbers<[1], [0], [0], [1], [0, 0, 1, 1], [], []>} : vector<16x128xbf16>, vector<128x128xbf16>, vector<16x128xf32> -> vector<16x128xf32>
    %c0_9 = arith.constant 0 : index
    %c0_10 = arith.constant 0 : index
    %11 = vector.load %arg5[%c0_9, %c0_10] : memref<1x128xf32, #tpu.memory_space<vmem>>, vector<1x128xf32>
    %12 = vector.broadcast %11 : vector<1x128xf32> to vector<16x128xf32>
    %13 = arith.addf %10, %12 : vector<16x128xf32>
    %cst_11 = arith.constant 0.000000e+00 : f32
    %14 = vector.broadcast %cst_11 : f32 to vector<16x128xf32>
    %15 = arith.maximumf %13, %14 : vector<16x128xf32>
    %16 = arith.truncf %15 : vector<16x128xf32> to vector<16x128xbf16>
    %c0_12 = arith.constant 0 : index
    %c0_13 = arith.constant 0 : index
    %17 = vector.load %arg6[%c0_12, %c0_13] : memref<128x128xbf16, #tpu.memory_space<vmem>>, vector<128x128xbf16>
    %cst_14 = arith.constant dense<0.000000e+00> : vector<16x128xf32>
    %18 = tpu.matmul %16, %17, %cst_14 {dimension_numbers = #tpu.dot_dimension_numbers<[1], [0], [0], [1], [0, 0, 1, 1], [], []>} : vector<16x128xbf16>, vector<128x128xbf16>, vector<16x128xf32> -> vector<16x128xf32>
    %c0_15 = arith.constant 0 : index
    %c0_16 = arith.constant 0 : index
    %19 = vector.load %arg7[%c0_15, %c0_16] : memref<1x128xf32, #tpu.memory_space<vmem>>, vector<1x128xf32>
    %20 = vector.broadcast %19 : vector<1x128xf32> to vector<16x128xf32>
    %21 = arith.addf %18, %20 : vector<16x128xf32>
    %22 = arith.truncf %21 : vector<16x128xf32> to vector<16x128xbf16>
    %c0_17 = arith.constant 0 : index
    %c0_18 = arith.constant 0 : index
    %23 = vector.load %arg8[%c0_17, %c0_18] : memref<16x128xbf16, #tpu.memory_space<vmem>>, vector<16x128xbf16>
    tpu.vector_store %arg8[%c0_17, %c0_18], %22 {strides = array<i32>} : memref<16x128xbf16, #tpu.memory_space<vmem>>, vector<16x128xbf16>,
    return
  }
  func.func @transform_0(%arg0: i32) -> (i32, i32) {
    %c0_i32 = arith.constant 0 : i32
    %c0_i32_0 = arith.constant 0 : i32
    return %arg0, %c0_i32 : i32, i32
  }
  func.func @transform_1(%arg0: i32) -> (i32, i32) {
    %c0_i32 = arith.constant 0 : i32
    %c0_i32_0 = arith.constant 0 : i32
    %c0_i32_1 = arith.constant 0 : i32
    return %c0_i32, %c0_i32_0 : i32, i32
  }
  func.func @transform_2(%arg0: i32) -> (i32, i32) {
    %c0_i32 = arith.constant 0 : i32
    %c0_i32_0 = arith.constant 0 : i32
    %c0_i32_1 = arith.constant 0 : i32
    return %c0_i32, %c0_i32_0 : i32, i32
  }
  func.func @transform_3(%arg0: i32) -> (i32, i32) {
    %c0_i32 = arith.constant 0 : i32
    %c0_i32_0 = arith.constant 0 : i32
    %c0_i32_1 = arith.constant 0 : i32
    return %c0_i32, %c0_i32_0 : i32, i32
  }
  func.func @transform_4(%arg0: i32) -> (i32, i32) {
    %c0_i32 = arith.constant 0 : i32
    %c0_i32_0 = arith.constant 0 : i32
    %c0_i32_1 = arith.constant 0 : i32
    return %c0_i32, %c0_i32_0 : i32, i32
  }
  func.func @transform_5(%arg0: i32) -> (i32, i32) {
    %c0_i32 = arith.constant 0 : i32
    %c0_i32_0 = arith.constant 0 : i32
    %c0_i32_1 = arith.constant 0 : i32
    return %c0_i32, %c0_i32_0 : i32, i32
  }
  func.func @transform_6(%arg0: i32) -> (i32, i32) {
    %c0_i32 = arith.constant 0 : i32
    %c0_i32_0 = arith.constant 0 : i32
    %c0_i32_1 = arith.constant 0 : i32
    return %c0_i32, %c0_i32_0 : i32, i32
  }
  func.func @transform_7(%arg0: i32) -> (i32, i32) {
    %c0_i32 = arith.constant 0 : i32
    %c0_i32_0 = arith.constant 0 : i32
    return %arg0, %c0_i32 : i32, i32
  }
}

</mosaic_0001>

<bundles_post_ra>
// kernel: qnetwork_forward.1
= control target key start
LH: loop header
LB: loop body
LE: loop exit
PB: predicated region body
PF: predicated region fallthrough
CT: control target
= control target key end

     0   :  { %12 = vsyncpa [#allocation3], 0  ;;  %s621_s0 = inlined_call_operand.vmem [shape: bf16[16,8], index: 0, kind: input, shape index: {}]   ;;  %s622_s1 = inlined_call_operand.vmem [shape: bf16[8,128], index: 1, kind: input, shape index: {}]   ;;  %s623_s2 = inlined_call_operand.vmem [shape: f32[1,128], index: 2, kind: input, shape index: {}]   ;;  %s624_s3 = inlined_call_operand.hbm [shape: bf16[128,128], index: 3, kind: input, shape index: {}]   ;;  %s625_s4 = inlined_call_operand.vmem [shape: f32[1,128], index: 4, kind: input, shape index: {}]   ;;  %s626_s5 = inlined_call_operand.hbm [shape: bf16[128,128], index: 5, kind: input, shape index: {}]   ;;  %s627_s6 = inlined_call_operand.vmem [shape: f32[1,128], index: 6, kind: input, shape index: {}]   ;;  %s628_s7 = inlined_call_operand.vmem [shape: bf16[16,128], index: 7, kind: output, shape index: {}]  }
   0x1   :  { %13 = vsyncpa [#allocation5], 0  ;;  %s528_s24 = smov [#allocation2]  }
   0x2   :  { %s25_s25 = sshll.u32 %s528_s24, 4  ;;  %s26_s25 = int_to_ptr.vmem [resolvable:$true] %s25_s25 }
   0x3   :  { %s492_s26 = scalar_lea.vmem %s26_s25, 1024  ;;  %p497_p1 = scmp.lt.s32.totalorder %s26_s25, %s26_s25 }
   0x4   :  { %p493_p0 = scmp.ne.s32.totalorder %s26_s25, %s492_s26  ;;  %p498_p2 = scmp.lt.s32.totalorder %s492_s26, %s492_s26 }
   0x6   :  { %p499_p3 = por %p498_p2, %p497_p1 }
   0x8   :  { %p500_p4 = pnand %p499_p3, %p493_p0 }
   0xa   :  { %503 = shalt.err (!%p500_p4)
}
   0xb   :  { %s529_s27 = smov 64   ;;  %s530_s28 = smov 4  }
   0xc   :  { %31 = dma.hbm_to_vmem [thread:$0]  %s624_s3, 1024, %s26_s25, [#allocation3], %s529_s27, %s529_s27, %s530_s28  }
   0xd   :  { %s531_s8 = smov [#allocation4]  }
   0xe   :  { %s39_s9 = sshll.u32 %s531_s8, 4  ;;  %s40_s9 = int_to_ptr.vmem [resolvable:$true] %s39_s9 }
   0xf   :  { %s512_s10 = scalar_lea.vmem %s40_s9, 1024  ;;  %p517_p6 = scmp.lt.s32.totalorder %s40_s9, %s40_s9 }
  0x10   :  { %p513_p5 = scmp.ne.s32.totalorder %s40_s9, %s512_s10  ;;  %p518_p7 = scmp.lt.s32.totalorder %s512_s10, %s512_s10 }
  0x12   :  { %p519_p8 = por %p518_p7, %p517_p6 }
  0x14   :  { %p520_p9 = pnand %p519_p8, %p513_p5 }
  0x16   :  { %523 = shalt.err (!%p520_p9)
}
  0x17   :  { %45 = dma.hbm_to_vmem [thread:$0]  %s626_s5, 1024, %s40_s9, [#allocation5], %s529_s27, %s529_s27, %s530_s28  }
  0x18   :  { %524 = dma.done.wait [#allocation3], 1024  }
  0x19   :  { %525 = vsyncadd [#allocation3], 4294966272 }
  0x1a   :  { %526 = dma.done.wait [#allocation5], 1024  }
  0x1b   :  { %527 = vsyncadd [#allocation5], 4294966272  ;;  %v532_v0 = vmov 0.0   ;;  %vm533_vm0 = vmmov 0   ;;  %vm74_vm1 = vcmask 1043456   ;;  %v467_v3 = vld [vmem:[%s621_s0] sm:$0xff]  }
  0x1c   :  { %415 = vmatprep.subr.bf16.mxu0 %v532_v0  ;;  %417 = vmatprep.mubr.msk.bf16.mxu0 %vm533_vm0, %v532_v0  ;;  %v57_v1 = vld [vmem:[%s622_s1] sm:$0xf]  ;;  %vm70_vm2 = vcmask 64512   ;;  %v468_v4 = vld [vmem:[#allocation2 + $0x38] sm:$0xff]   ;;  %v469_v5 = vld [vmem:[#allocation2 + $0x30] sm:$0xff]  }
  0x1d   :  { %421 = vmatprep.subr.bf16.mxu1 %v532_v0  ;;  %437 = vmatprep.mubr.msk.bf16.mxu1 %vm533_vm0, %v532_v0  ;;  %v76_v2 = vsel %vm74_vm1, %v57_v1, 0  ;;  %v470_v6 = vld [vmem:[#allocation2 + $0x28] sm:$0xff]   ;;  %v471_v7 = vld [vmem:[#allocation2 + $0x20] sm:$0xff]   ;;  %v472_v8 = vld [vmem:[#allocation2 + $0x18] sm:$0xff]  }
  0x1e   :  { %416 = vmatpush3.bf16.msra.mxu0 %v76_v2  ;;  %422 = vmatpush3.bf16.msra.mxu1 %v468_v4  ;;  %v473_v9 = vld [vmem:[#allocation2 + $0x10] sm:$0xff]   ;;  %v474_v10 = vld [vmem:[#allocation2 + $0x8] sm:$0xff]   ;;  %v475_v11 = vld [vmem:[#allocation2] sm:$0xff]  }
  0x1f   :  { %441 = vmatprep.subr.bf16.mxu0 %v532_v0  ;;  %423 = vmatprep.subr.bf16.mxu1 %v532_v0  ;;  %v476_v12 = vld [vmem:[#allocation4 + $0x38] sm:$0xff]   ;;  %v477_v13 = vld [vmem:[#allocation4 + $0x30] sm:$0xff]   ;;  %v478_v14 = vld [vmem:[#allocation4 + $0x28] sm:$0xff]  }
  0x20   :  { %v479_v15 = vld [vmem:[#allocation4 + $0x20] sm:$0xff]   ;;  %v480_v16 = vld [vmem:[#allocation4 + $0x18] sm:$0xff]   ;;  %v481_v27 = vld [vmem:[#allocation4 + $0x10] sm:$0xff]  }
  0x21   :  { %418 = vmatmul.mubr.msk.bf16.vlgmr.msra.gmra.mxu0 %vm70_vm2, %v467_v3  ;;  %v365_v17 = vld [vmem:[%s623_s2] ss:$0 sm:$0xff]  ;;  %v482_v28 = vld [vmem:[#allocation4 + $0x8] sm:$0xff]  }
  0x22   :  { %457 = vmatprep.mubr.msk.bf16.mxu0 %vm533_vm0, %v532_v0  ;;  %424 = vmatpush3.bf16.msra.mxu1 %v469_v5  ;;  %v483_v29 = vld [vmem:[#allocation4] sm:$0xff]  }
  0x23   :  { %425 = vmatprep.subr.bf16.mxu1 %v532_v0  ;;  %442 = vmatpush3.bf16.msra.mxu0 %v476_v12  ;;  %v368_v30 = vld [vmem:[%s625_s4] ss:$0 sm:$0xff] }
  0x24   :  { %443 = vmatprep.subr.bf16.mxu0 %v532_v0  ;;  %v377_v41 = vld [vmem:[%s627_s6] ss:$0 sm:$0xff] }
  0x26   :  { %426 = vmatpush3.bf16.msra.mxu1 %v470_v6 }
  0x27   :  { %427 = vmatprep.subr.bf16.mxu1 %v532_v0  ;;  %444 = vmatpush3.bf16.msra.mxu0 %v477_v13 }
  0x28   :  { %445 = vmatprep.subr.bf16.mxu0 %v532_v0 }
  0x2a   :  { %428 = vmatpush3.bf16.msra.mxu1 %v471_v7 }
  0x2b   :  { %429 = vmatprep.subr.bf16.mxu1 %v532_v0  ;;  %446 = vmatpush3.bf16.msra.mxu0 %v478_v14 }
  0x2c   :  { %447 = vmatprep.subr.bf16.mxu0 %v532_v0 }
  0x2e   :  { %430 = vmatpush3.bf16.msra.mxu1 %v472_v8 }
  0x2f   :  { %431 = vmatprep.subr.bf16.mxu1 %v532_v0  ;;  %448 = vmatpush3.bf16.msra.mxu0 %v479_v15 }
  0x30   :  { %449 = vmatprep.subr.bf16.mxu0 %v532_v0 }
  0x32   :  { %432 = vmatpush3.bf16.msra.mxu1 %v473_v9 }
  0x33   :  { %433 = vmatprep.subr.bf16.mxu1 %v532_v0  ;;  %450 = vmatpush3.bf16.msra.mxu0 %v480_v16 }
  0x34   :  { %451 = vmatprep.subr.bf16.mxu0 %v532_v0 }
  0x36   :  { %434 = vmatpush3.bf16.msra.mxu1 %v474_v10 }
  0x37   :  { %435 = vmatprep.subr.bf16.mxu1 %v532_v0  ;;  %452 = vmatpush3.bf16.msra.mxu0 %v481_v27 }
  0x38   :  { %453 = vmatprep.subr.bf16.mxu0 %v532_v0 }
  0x3a   :  { %436 = vmatpush3.bf16.msra.mxu1 %v475_v11 }
  0x3b   :  { %454 = vmatpush3.bf16.msra.mxu0 %v482_v28 }
  0x3c   :  { %455 = vmatprep.subr.bf16.mxu0 %v532_v0 }
  0x3f   :  { %456 = vmatpush3.bf16.msra.mxu0 %v483_v29 }
  0xe1   :  { %v112_v18 = vpop.f32.mrf.mxu0 }
  0xe2   :  { %v113_v20 = vadd.f32 %v365_v17, %v112_v18 }
  0xe3   :  { %v419_v19 = vpop.f32.mrf.mxu0 }
  0xe4   :  { %v119_v24 = vmax.f32 %v113_v20, 0.0 }
  0xe5   :  { %v115_v21 = vpop.f32.mrf.mxu0 }
  0xe6   :  { %v116_v22 = vadd.f32 %v365_v17, %v115_v21 }
  0xe7   :  { %v420_v23 = vpop.f32.mrf.mxu0 }
  0xe8   :  { %v120_v25 = vmax.f32 %v116_v22, 0.0 }
  0xea   :  { %v121_v26 = vpack.c.bf16 %v120_v25, %v119_v24 }
  0xec   :  { %438 = vmatmul.mubr.bf16.vlgmr.msra.gmra.mxu1 %v121_v26 }
 0x1ac   :  { %v227_v31 = vpop.f32.mrf.mxu1 }
 0x1ad   :  { %v228_v33 = vadd.f32 %v368_v30, %v227_v31 }
 0x1ae   :  { %v439_v32 = vpop.f32.mrf.mxu1 }
 0x1af   :  { %v234_v37 = vmax.f32 %v228_v33, 0.0 }
 0x1b0   :  { %v230_v34 = vpop.f32.mrf.mxu1 }
 0x1b1   :  { %v231_v35 = vadd.f32 %v368_v30, %v230_v34 }
 0x1b2   :  { %v440_v36 = vpop.f32.mrf.mxu1 }
 0x1b3   :  { %v235_v38 = vmax.f32 %v231_v35, 0.0 }
 0x1b5   :  { %v236_v39 = vpack.c.bf16 %v235_v38, %v234_v37 }
 0x1b7   :  { %458 = vmatmul.mubr.bf16.vlgmr.msra.gmra.mxu0 %v236_v39 }
 0x277   :  { %v342_v40 = vpop.f32.mrf.mxu0 }
 0x278   :  { %v343_v44 = vadd.f32 %v377_v41, %v342_v40 }
 0x279   :  { %v459_v42 = vpop.f32.mrf.mxu0 }
 0x27b   :  { %v345_v43 = vpop.f32.mrf.mxu0 }
 0x27c   :  { %v346_v45 = vadd.f32 %v377_v41, %v345_v43 }
 0x27d   :  { %v460_v46 = vpop.f32.mrf.mxu0 }
 0x27e   :  { %v393_v47 = vpack.c.bf16 %v346_v45, %v343_v44 }
 0x280   :  { %394 = vst [vmem:[%s628_s7] sm:$0xff] %v393_v47  }
 0x281   :  { %363 = vsyncpa [#allocation3], 1 }
 0x282   :  { %364 = vsyncpa [#allocation5], 1 }

</bundles_post_ra>
